<compile_context>
chip_gen: v7x
topology: tpu7x:2x2x1
jax: 0.10.0
libtpu: 0.0.40
codegen_flags: <defaults>
</compile_context>

<pallas_src>
import jax
import jax.numpy as jnp
import numpy as np
from jax.experimental import pallas as pl
from jax.experimental.pallas import tpu as pltpu


# ----------------------------------------------------------------------------
# Kernels
# ----------------------------------------------------------------------------
def _channel_pool_kernel(x_ref, max_ref, sum_ref):
    """Pass 1: accumulate global channel max & sum across H tiles."""
    x = x_ref[0].astype(jnp.float32)                                  # (TH, W, C)
    tile_max = jnp.max(jnp.max(x, axis=0), axis=0, keepdims=True)     # (1, C)
    tile_sum = jnp.sum(jnp.sum(x, axis=0), axis=0, keepdims=True)     # (1, C)
    h = pl.program_id(1)

    @pl.when(h == 0)
    def _():
        max_ref[0] = tile_max
        sum_ref[0] = tile_sum

    @pl.when(h > 0)
    def _():
        max_ref[0] = jnp.maximum(max_ref[0], tile_max)
        sum_ref[0] = sum_ref[0] + tile_sum


def _spatial_pool_kernel(x_ref, ch_ref, pmax_ref, pmean_ref):
    """Pass 2a: per-pixel channel max / mean of (channel-attention * x)."""
    C = x_ref.shape[-1]
    x = x_ref[0].astype(jnp.float32)                                  # (TH, W, C)
    y = x * ch_ref[...]                                               # (1,1,C) bcast
    pmax_ref[0] = jnp.max(y, axis=-1, keepdims=True)                  # (TH, W, 1)
    pmean_ref[0] = jnp.sum(y, axis=-1, keepdims=True) * (1.0 / C)     # (TH, W, 1)


def _conv_gate_kernel(wsp_ref, pmax_ref, pmean_ref, x_ref, o_ref,
                      pmax_pad, pmean_pad):
    """Pass 2b: 3x3 'same' conv on pooled maps, ReLU, gate the ORIGINAL x."""
    _, H, W, _ = pmax_ref.shape
    _, TH, _, _ = x_ref.shape

    # Zero-pad the small full-image pooled maps into VMEM scratch so every H
    # tile can read its +/-1-row conv halo.  Shifts only touch outer/sublane
    # axes; the lane axis (size 1) is never sliced.
    zpad = jnp.zeros((H + 2, W + 2, 1), jnp.float32)
    pmax_pad[...] = jax.lax.dynamic_update_slice(zpad, pmax_ref[0], (1, 1, 0))
    pmean_pad[...] = jax.lax.dynamic_update_slice(zpad, pmean_ref[0], (1, 1, 0))

    row0 = pl.program_id(1) * TH
    conv = jnp.zeros((TH, W, 1), jnp.float32)
    # 9 accumulating VPU FMAs with per-tap SMEM scalar weights: no im2col lane
    # concatenate, no wide lane reduce (review item).
    for kh in range(3):
        for kw in range(3):
            w_max = wsp_ref[kh * 6 + kw * 2 + 0]
            w_avg = wsp_ref[kh * 6 + kw * 2 + 1]
            conv = conv + pmax_pad[pl.ds(row0 + kh, TH), pl.ds(kw, W), :] * w_max
            conv = conv + pmean_pad[pl.ds(row0 + kh, TH), pl.ds(kw, W), :] * w_avg
    sp = jnp.maximum(conv, 0.0)                                       # (TH, W, 1)

    x = x_ref[0].astype(jnp.float32)                                  # (TH, W, C)
    o_ref[0] = (sp * x).astype(o_ref.dtype)


# ----------------------------------------------------------------------------
# VMEM budgeting helpers
# ----------------------------------------------------------------------------
def _pass_vmem_estimate(TH, H, W, C, x_bytes, o_bytes):
    x_blk = 2 * TH * W * C * x_bytes           # double-buffered input tile
    o_blk = 2 * TH * W * C * o_bytes           # double-buffered output tile
    maps = 2 * 2 * H * W * 4                   # two f32 pooled maps, double-buffered
    pad = 2 * (H + 2) * (W + 2) * 4            # padded-map scratch
    tmp = 2 * TH * W * C * 4                   # in-kernel f32 temporaries
    return x_blk + o_blk + maps + pad + tmp


def _vmem_limit_bytes(est):
    # >= 32 MiB (above the 16/32 MiB scoped defaults on v5e/v6e/v7x when the
    # estimate needs it), capped at v7x's 64 MiB physical VMEM.
    return int(min(64 * 2 ** 20, max(32 * 2 ** 20, 2 * est)))


def _pick_tile_h(H, W, C, x_itemsize, budget_bytes=40 * 2 ** 20):
    if H % 8 != 0:
        return H                               # odd spatial size: single tile
    cands = [t for t in range(8, H + 1, 8) if H % t == 0]
    fits = [t for t in cands
            if _pass_vmem_estimate(t, H, W, C, x_itemsize, x_itemsize) <= budget_bytes]
    return max(fits) if fits else min(cands)


# ----------------------------------------------------------------------------
# Wrappers
# ----------------------------------------------------------------------------
def dual_attention_nhwc(x, params, *, tile_h=None):
    """DualAttentionModule forward.  x: (B, H, W, C) NHWC, any float dtype.

    Keeps activations NHWC end-to-end (no layout transposes).  Pooling / MLP /
    conv math is f32 in-kernel; the HBM-resident feature map keeps x.dtype
    (bf16 supported at the HBM boundary).
    """
    B, H, W, C = x.shape
    w1, b1 = params["mlp_w1"], params["mlp_b1"]
    w2, b2 = params["mlp_w2"], params["mlp_b2"]
    wsp = params["spatial_w"].astype(jnp.float32).reshape(18)  # (3,3,2) row-major

    itemsize = jnp.dtype(x.dtype).itemsize
    TH = _pick_tile_h(H, W, C, itemsize) if tile_h is None else int(tile_h)
    if H % TH != 0 or not (TH % 8 == 0 or TH == H):
        raise ValueError(f"tile_h={TH} must divide H={H} and be a multiple of 8 "
                         "(or equal H)")
    nH = H // TH

    vlim = _vmem_limit_bytes(_pass_vmem_estimate(TH, H, W, C, itemsize, itemsize))

    # ---- pass 1: tiled global channel max / sum ---------------------------
    stats_max, stats_sum = pl.pallas_call(
        _channel_pool_kernel,
        grid=(B, nH),
        in_specs=[pl.BlockSpec((1, TH, W, C), lambda b, h: (b, h, 0, 0))],
        out_specs=[pl.BlockSpec((1, 1, C), lambda b, h: (b, 0, 0)),
                   pl.BlockSpec((1, 1, C), lambda b, h: (b, 0, 0))],
        out_shape=(jax.ShapeDtypeStruct((B, 1, C), jnp.float32),
                   jax.ShapeDtypeStruct((B, 1, C), jnp.float32)),
        compiler_params=pltpu.CompilerParams(
            dimension_semantics=("parallel", "arbitrary"),
            vmem_limit_bytes=vlim),
    )(x)

    # ---- channel-attention MLP (tiny; off the HBM-bound critical path) ----
    def mlp(v):
        hmid = jnp.maximum(
            jnp.dot(v, w1, precision=jax.lax.Precision.HIGHEST) + b1, 0.0)
        return jnp.dot(hmid, w2, precision=jax.lax.Precision.HIGHEST) + b2

    mx = stats_max[:, 0, :]
    av = stats_sum[:, 0, :] * (1.0 / (H * W))
    ch = jax.nn.sigmoid(mlp(mx) + mlp(av))[:, None, :]                # (B, 1, C)

    # ---- pass 2a: per-pixel channel max / mean of ch*x --------------------
    pmax, pmean = pl.pallas_call(
        _spatial_pool_kernel,
        grid=(B, nH),
        in_specs=[pl.BlockSpec((1, TH, W, C), lambda b, h: (b, h, 0, 0)),
                  pl.BlockSpec((1, 1, C), lambda b, h: (b, 0, 0))],
        out_specs=[pl.BlockSpec((1, TH, W, 1), lambda b, h: (b, h, 0, 0)),
                   pl.BlockSpec((1, TH, W, 1), lambda b, h: (b, h, 0, 0))],
        out_shape=(jax.ShapeDtypeStruct((B, H, W, 1), jnp.float32),
                   jax.ShapeDtypeStruct((B, H, W, 1), jnp.float32)),
        compiler_params=pltpu.CompilerParams(
            dimension_semantics=("parallel", "parallel"),
            vmem_limit_bytes=vlim),
    )(x, ch)

    # ---- pass 2b: 3x3 conv on pooled maps, ReLU, gate original x ----------
    out = pl.pallas_call(
        _conv_gate_kernel,
        grid=(B, nH),
        in_specs=[pl.BlockSpec(memory_space=pltpu.MemorySpace.SMEM),   # conv weights
                  pl.BlockSpec((1, H, W, 1), lambda b, h: (b, 0, 0, 0)),
                  pl.BlockSpec((1, H, W, 1), lambda b, h: (b, 0, 0, 0)),
                  pl.BlockSpec((1, TH, W, C), lambda b, h: (b, h, 0, 0))],
        out_specs=pl.BlockSpec((1, TH, W, C), lambda b, h: (b, h, 0, 0)),
        out_shape=jax.ShapeDtypeStruct((B, H, W, C), x.dtype),
        scratch_shapes=[pltpu.VMEM((H + 2, W + 2, 1), jnp.float32),
                        pltpu.VMEM((H + 2, W + 2, 1), jnp.float32)],
        compiler_params=pltpu.CompilerParams(
            dimension_semantics=("parallel", "parallel"),
            vmem_limit_bytes=vlim),
    )(wsp, pmax, pmean, x)
    return out


def dual_attention_nchw(x_nchw, params, *, tile_h=None):
    """PyTorch-facing NCHW compatibility wrapper.

    NOTE: each transpose is an extra full HBM read+write — keep activations
    NHWC end-to-end in production and call dual_attention_nhwc directly.
    """
    x = jnp.transpose(x_nchw, (0, 2, 3, 1))
    out = dual_attention_nhwc(x, params, tile_h=tile_h)
    return jnp.transpose(out, (0, 3, 1, 2))


# ----------------------------------------------------------------------------
# Pure-JAX reference (correctness check), NHWC
# ----------------------------------------------------------------------------
def _dual_attention_ref_nhwc(x, params):
    xf = x.astype(jnp.float32)
    B, H, W, C = xf.shape
    w1, b1 = params["mlp_w1"], params["mlp_b1"]
    w2, b2 = params["mlp_w2"], params["mlp_b2"]
    wsp = params["spatial_w"].astype(jnp.float32)                     # (3, 3, 2)

    def mlp(v):
        h = jnp.maximum(
            jnp.dot(v, w1, precision=jax.lax.Precision.HIGHEST) + b1, 0.0)
        return jnp.dot(h, w2, precision=jax.lax.Precision.HIGHEST) + b2

    mx = jnp.max(xf, axis=(1, 2))
    av = jnp.mean(xf, axis=(1, 2))
    ch = jax.nn.sigmoid(mlp(mx) + mlp(av))                            # (B, C)
    y = xf * ch[:, None, None, :]
    pooled = jnp.stack([jnp.max(y, -1), jnp.mean(y, -1)], axis=-1)    # (B,H,W,2)
    pp = jnp.pad(pooled, ((0, 0), (1, 1), (1, 1), (0, 0)))
    conv = jnp.zeros((B, H, W), jnp.float32)
    for kh in range(3):
        for kw in range(3):
            conv = conv + jnp.einsum(
                "bhwc,c->bhw", pp[:, kh:kh + H, kw:kw + W, :], wsp[kh, kw],
                precision=jax.lax.Precision.HIGHEST)
    sp = jnp.maximum(conv, 0.0)
    return sp[..., None] * xf


# ----------------------------------------------------------------------------
if __name__ == "__main__":
    # Small stand-in shapes: C=64 plays the real net's channels; reduction
    # ratio q=16 -> MLP hidden = C // q = 4.
    B, C, H, W = 2, 64, 16, 16
    q = 16

    key = jax.random.PRNGKey(0)
    ks = jax.random.split(key, 6)

    def w_init(k, shape, scale=0.05):
        return (scale * jax.random.normal(k, shape)).astype(jnp.float32)

    params = {
        "mlp_w1": w_init(ks[0], (C, C // q)),        # transpose of torch Linear.weight
        "mlp_b1": w_init(ks[1], (1, C // q)),
        "mlp_w2": w_init(ks[2], (C // q, C)),
        "mlp_b2": w_init(ks[3], (1, C)),
        "spatial_w": w_init(ks[4], (3, 3, 2)),       # (kh, kw, [max, mean]) of Conv2d(2,1,3)
    }

    x_nhwc = jax.random.normal(ks[5], (B, H, W, C), dtype=jnp.float32)
    # Pixel with ALL channels negative: exercises the masked-lane channel max
    # (C=64 < 128, so the lane axis is physically padded).
    x_nhwc = x_nhwc.at[0, 3, 5, :].set(-jnp.abs(x_nhwc[0, 3, 5, :]) - 1.0)

    ref = jax.block_until_ready(_dual_attention_ref_nhwc(x_nhwc, params))

    # f32, H-tiled (tile_h=8 -> 2 H-tiles): exercises the tiled pooling
    # accumulator and the conv halo across tile boundaries.
    out = jax.block_until_ready(dual_attention_nhwc(x_nhwc, params, tile_h=8))
    assert out.shape == (B, H, W, C), out.shape
    np.testing.assert_allclose(np.asarray(out), np.asarray(ref), rtol=1e-3, atol=1e-3)

    # f32, auto-picked tile (single tile at this small H): exercises _pick_tile_h.
    out_auto = jax.block_until_ready(dual_attention_nhwc(x_nhwc, params))
    np.testing.assert_allclose(np.asarray(out_auto), np.asarray(ref), rtol=1e-3, atol=1e-3)

    # bf16 at the HBM boundary (pooling/MLP/conv stay f32 in-kernel).
    x_bf16 = x_nhwc.astype(jnp.bfloat16)
    out_bf = jax.block_until_ready(dual_attention_nhwc(x_bf16, params, tile_h=8))
    ref_bf = jax.block_until_ready(_dual_attention_ref_nhwc(x_bf16, params))
    np.testing.assert_allclose(np.asarray(out_bf).astype(np.float32),
                               np.asarray(ref_bf), rtol=2e-2, atol=2e-2)

    # PyTorch-facing NCHW compatibility wrapper.
    x_nchw = jnp.transpose(x_nhwc, (0, 3, 1, 2))
    out_nchw = jax.block_until_ready(dual_attention_nchw(x_nchw, params, tile_h=8))
    np.testing.assert_allclose(np.asarray(out_nchw),
                               np.asarray(jnp.transpose(ref, (0, 3, 1, 2))),
                               rtol=1e-3, atol=1e-3)

    print("KERNEL_OK")
</pallas_src>

<mosaic_0001>
module attributes {stable_mosaic.version = 11 : i64} {
  func.func @_channel_pool_kernel(%arg0: i32, %arg1: i32, %arg2: memref<1x8x16x64xf32, #tpu.memory_space<vmem>>, %arg3: memref<1x1x64xf32, #tpu.memory_space<vmem>>, %arg4: memref<1x1x64xf32, #tpu.memory_space<vmem>>) attributes {dimension_semantics = [#tpu.dimension_semantics<parallel>, #tpu.dimension_semantics<arbitrary>], iteration_bounds = array<i64: 2, 2>, scalar_prefetch = 0 : i64, scratch_operands = 0 : i64, tpu.core_type = #tpu.core_type<tc>, window_params = [{transform_indices = @transform_0, window_bounds = array<i64: 1, 8, 16, 64>}, {transform_indices = @transform_1, window_bounds = array<i64: 1, 1, 64>}, {transform_indices = @transform_2, window_bounds = array<i64: 1, 1, 64>}]} {
    %c0 = arith.constant 0 : index
    %c0_0 = arith.constant 0 : index
    %c0_1 = arith.constant 0 : index
    %c0_2 = arith.constant 0 : index
    %0 = vector.load %arg2[%c0, %c0_0, %c0_1, %c0_2] : memref<1x8x16x64xf32, #tpu.memory_space<vmem>>, vector<1x8x16x64xf32>
    %1 = vector.shape_cast %0 : vector<1x8x16x64xf32> to vector<8x16x64xf32>
    %cst = arith.constant dense<0xFF800000> : vector<16x64xf32>
    %2 = vector.multi_reduction <maximumf>, %1, %cst [0] : vector<8x16x64xf32> to vector<16x64xf32>
    %cst_3 = arith.constant dense<0xFF800000> : vector<64xf32>
    %3 = vector.multi_reduction <maximumf>, %2, %cst_3 [0] : vector<16x64xf32> to vector<64xf32>
    %4 = vector.shape_cast %3 : vector<64xf32> to vector<1x64xf32>
    %cst_4 = arith.constant dense<0.000000e+00> : vector<16x64xf32>
    %5 = vector.multi_reduction <add>, %1, %cst_4 [0] : vector<8x16x64xf32> to vector<16x64xf32>
    %cst_5 = arith.constant dense<0.000000e+00> : vector<64xf32>
    %6 = vector.multi_reduction <add>, %5, %cst_5 [0] : vector<16x64xf32> to vector<64xf32>
    %7 = vector.shape_cast %6 : vector<64xf32> to vector<1x64xf32>
    %c0_i32 = arith.constant 0 : i32
    %8 = arith.cmpi eq, %arg1, %c0_i32 : i32
    %9 = arith.extui %8 : i1 to i32
    %c0_i32_6 = arith.constant 0 : i32
    %10 = arith.cmpi ne, %9, %c0_i32_6 : i32
    scf.if %10 {
      %c0_9 = arith.constant 0 : index
      %c0_10 = arith.constant 0 : index
      %c0_11 = arith.constant 0 : index
      %14 = vector.load %arg3[%c0_9, %c0_10, %c0_11] : memref<1x1x64xf32, #tpu.memory_space<vmem>>, vector<1x1x64xf32>
      %15 = vector.shape_cast %14 : vector<1x1x64xf32> to vector<1x64xf32>
      %16 = vector.shape_cast %4 : vector<1x64xf32> to vector<1x1x64xf32>
      tpu.vector_store %arg3[%c0_9, %c0_10, %c0_11], %16 {strides = array<i32>} : memref<1x1x64xf32, #tpu.memory_space<vmem>>, vector<1x1x64xf32>,
      %c0_12 = arith.constant 0 : index
      %c0_13 = arith.constant 0 : index
      %c0_14 = arith.constant 0 : index
      %17 = vector.load %arg4[%c0_12, %c0_13, %c0_14] : memref<1x1x64xf32, #tpu.memory_space<vmem>>, vector<1x1x64xf32>
      %18 = vector.shape_cast %17 : vector<1x1x64xf32> to vector<1x64xf32>
      %19 = vector.shape_cast %7 : vector<1x64xf32> to vector<1x1x64xf32>
      tpu.vector_store %arg4[%c0_12, %c0_13, %c0_14], %19 {strides = array<i32>} : memref<1x1x64xf32, #tpu.memory_space<vmem>>, vector<1x1x64xf32>,
    } else {
    }
    %c0_i32_7 = arith.constant 0 : i32
    %11 = arith.cmpi sgt, %arg1, %c0_i32_7 : i32
    %12 = arith.extui %11 : i1 to i32
    %c0_i32_8 = arith.constant 0 : i32
    %13 = arith.cmpi ne, %12, %c0_i32_8 : i32
    scf.if %13 {
      %c0_9 = arith.constant 0 : index
      %c0_10 = arith.constant 0 : index
      %c0_11 = arith.constant 0 : index
      %14 = vector.load %arg3[%c0_9, %c0_10, %c0_11] : memref<1x1x64xf32, #tpu.memory_space<vmem>>, vector<1x1x64xf32>
      %15 = vector.shape_cast %14 : vector<1x1x64xf32> to vector<1x64xf32>
      %16 = arith.maximumf %15, %4 : vector<1x64xf32>
      %c0_12 = arith.constant 0 : index
      %c0_13 = arith.constant 0 : index
      %c0_14 = arith.constant 0 : index
      %17 = vector.load %arg3[%c0_12, %c0_13, %c0_14] : memref<1x1x64xf32, #tpu.memory_space<vmem>>, vector<1x1x64xf32>
      %18 = vector.shape_cast %17 : vector<1x1x64xf32> to vector<1x64xf32>
      %19 = vector.shape_cast %16 : vector<1x64xf32> to vector<1x1x64xf32>
      tpu.vector_store %arg3[%c0_12, %c0_13, %c0_14], %19 {strides = array<i32>} : memref<1x1x64xf32, #tpu.memory_space<vmem>>, vector<1x1x64xf32>,
      %c0_15 = arith.constant 0 : index
      %c0_16 = arith.constant 0 : index
      %c0_17 = arith.constant 0 : index
      %20 = vector.load %arg4[%c0_15, %c0_16, %c0_17] : memref<1x1x64xf32, #tpu.memory_space<vmem>>, vector<1x1x64xf32>
      %21 = vector.shape_cast %20 : vector<1x1x64xf32> to vector<1x64xf32>
      %22 = arith.addf %21, %7 : vector<1x64xf32>
      %c0_18 = arith.constant 0 : index
      %c0_19 = arith.constant 0 : index
      %c0_20 = arith.constant 0 : index
      %23 = vector.load %arg4[%c0_18, %c0_19, %c0_20] : memref<1x1x64xf32, #tpu.memory_space<vmem>>, vector<1x1x64xf32>
      %24 = vector.shape_cast %23 : vector<1x1x64xf32> to vector<1x64xf32>
      %25 = vector.shape_cast %22 : vector<1x64xf32> to vector<1x1x64xf32>
      tpu.vector_store %arg4[%c0_18, %c0_19, %c0_20], %25 {strides = array<i32>} : memref<1x1x64xf32, #tpu.memory_space<vmem>>, vector<1x1x64xf32>,
    } else {
    }
    return
  }
  func.func @transform_0(%arg0: i32, %arg1: i32) -> (i32, i32, i32, i32) {
    %c0_i32 = arith.constant 0 : i32
    %c0_i32_0 = arith.constant 0 : i32
    %c0_i32_1 = arith.constant 0 : i32
    return %arg0, %arg1, %c0_i32, %c0_i32_0 : i32, i32, i32, i32
  }
  func.func @transform_1(%arg0: i32, %arg1: i32) -> (i32, i32, i32) {
    %c0_i32 = arith.constant 0 : i32
    %c0_i32_0 = arith.constant 0 : i32
    %c0_i32_1 = arith.constant 0 : i32
    return %arg0, %c0_i32, %c0_i32_0 : i32, i32, i32
  }
  func.func @transform_2(%arg0: i32, %arg1: i32) -> (i32, i32, i32) {
    %c0_i32 = arith.constant 0 : i32
    %c0_i32_0 = arith.constant 0 : i32
    %c0_i32_1 = arith.constant 0 : i32
    return %arg0, %c0_i32, %c0_i32_0 : i32, i32, i32
  }
}

</mosaic_0001>

<bundles_post_ra>
// kernel: tpu_custom_call.1
= control target key start
LH: loop header
LB: loop body
LE: loop exit
PB: predicated region body
PF: predicated region fallthrough
CT: control target
= control target key end

     0   :  { %8 = vsyncpa [#allocation3], 0  ;;  %s1078_s0 = inlined_call_operand.hbm [shape: f32[2,16,16,64], index: 0, kind: input, shape index: {}]   ;;  %s1079_s1 = inlined_call_operand.hbm [shape: f32[2,1,64], index: 1, kind: output, shape index: {0}]   ;;  %s1080_s2 = inlined_call_operand.hbm [shape: f32[2,1,64], index: 2, kind: output, shape index: {1}]  }
   0x1   :  { %10 = vsyncpa [#allocation3 + $0x1], 0 }
   0x2   :  { %11 = vsyncpa [#allocation4], 0 }
   0x3   :  { %13 = vsyncpa [#allocation4 + $0x1], 0 }
   0x4   :  { %14 = vsyncpa [#allocation7], 0 }
   0x5   :  { %16 = vsyncpa [#allocation7 + $0x1], 0  ;;  %s773_s9 = smov 0   ;;  %s775_s10 = smov 0  }
   0x6   :  { %s777_s11 = smov 0   ;;  %s779_s12 = smov 0  }
   0x7   :  { %s781_s13 = smov 0   ;;  %s783_s14 = smov 0  }
   0x8   :  { %s785_s15 = smov 0   ;;  %s787_s16 = smov 0  }
   0x9   :  { %s789_s17 = smov 0   ;;  %s791_s18 = smov 0  }
   0xa   :  { %s793_s19 = smov 0  }
   0xb LB: > { %s440_s20 = sadd.s32 4294967295, %s751_s19   ;;  %s441_s21 = sadd.s32 4294967294, %s751_s19   ;;  %s751_s19 = sphi %s793_s19, %s22_s19   ;;  %s747_s18 = sphi %s791_s18, %s1104_s18   ;;  %s743_s17 = sphi %s789_s17, %s1103_s17   ;;  %s739_s16 = sphi %s787_s16, %s1102_s16   ;;  %s735_s15 = sphi %s785_s15, %s1101_s15   ;;  %s731_s14 = sphi %s783_s14, %s1100_s14   ;;  %s727_s13 = sphi %s781_s13, %s1099_s13   ;;  %s723_s12 = sphi %s779_s12, %s1098_s12   ;;  %s719_s11 = sphi %s777_s11, %s1097_s11   ;;  %s715_s10 = sphi %s775_s10, %s1096_s10   ;;  %s711_s9 = sphi %s773_s9, %s1095_s9  }
   0xc   : > { %s31_s22 = sadd.s32 1, %s743_s17  ;;  %s34_s23 = sadd.s32 1, %s747_s18 }
   0xd   : > { %p32_p0 = scmp.ge.s32.totalorder %s31_s22, 2  ;;  %s43_s24 = sadd.s32 1, %s731_s14 }
   0xe   : > { %p50_p1 = scmp.ne.s32.totalorder %s731_s14, %s727_s13  ;;  %p51_p2 = scmp.eq.s32.totalorder %s751_s19, 0 }
   0xf   : > { %s1106_s22 = smov (%p32_p0, %s31_s22), 0  ;;  %s1108_s23 = smov (!%p32_p0, %s34_s23), %s747_s18 }
  0x10   : > { %1084 = sst [smem:[#allocation11_spill]] %s1106_s22  ;;  %s39_s25 = ssub.s32 %s743_s17, %s1106_s22 }
  0x11   : > { %p839_p3 = por %p51_p2, %p50_p1  ;;  %p36_p4 = scmp.ge.s32.totalorder %s1108_s23, 2 }
  0x12   : > { %p56_p5 = scmp.ne.s32.totalorder %s727_s13, %s723_s12  ;;  %p57_p6 = scmp.eq.s32.totalorder %s440_s20, 0 }
  0x13   : > { %s69_s27 = sadd.s32 1, %s719_s11  ;;  %s1110_s23 = smov (%p36_p4, %s1108_s23), 0 }
  0x14   : > { %1086 = sst [smem:[#allocation12_spill]] %s1110_s23  ;;  %p847_p7 = por %p57_p6, %p56_p5 }
  0x15   : > { %p79_p8 = scmp.ne.s32.totalorder %s719_s11, %s715_s10  ;;  %s38_s29 = ssub.s32 %s747_s18, %s1110_s23 }
  0x16   : > { %p80_p9 = scmp.eq.s32.totalorder %s440_s20, 3  ;;  %s40_s30 = sor.u32 %s39_s25, %s38_s29 }
  0x17   : > { %p67_p10 = scmp.eq.s32.totalorder %s38_s29, 0  ;;  %p41_p11 = scmp.eq.s32.totalorder %s40_s30, 0 }
  0x18   : > { %p855_p12 = por %p80_p9, %p79_p8  ;;  %p85_p13 = scmp.ne.s32.totalorder %s715_s10, %s711_s9 }
  0x19   : > { %s860_s4 = scalar_select %p67_p10, %s719_s11, %s69_s27  }
  0x1a   : > { %s1088_s3 = scalar_select %p855_p12, 1, 0 }
  0x1b   : > { %s863_s5 = scalar_select %p41_p11, %s731_s14, %s43_s24  }
  0x1c   : > { %p86_p0 = scmp.eq.s32.totalorder %s441_s21, 3  ;;  %p475_p1 = scmp.lt.s32.totalorder %s751_s19, 4 }
  0x1d   : > { %s132_s7 = sand.u32 1, %s731_s14   ;;  %s457_s12 = sshll.u32 %s743_s17, 4 }
  0x1e   : > { %p868_p2 = por %p86_p0, %p85_p13  ;;  %s444_s8 = sshll.u32 %s132_s7, 7 }
  0x1f   : > { %s447_s20 = sshll.u32 %s747_s18, 5  ;;  %s136_s25 = scalar_lea.vmem [#allocation2], %s444_s8 }
  0x20   : > { %s1089_s6 = scalar_select %p868_p2, 1, 0 }
  0x21   : > { %s146_s29 = sshll.u32 %s136_s25, 4  ;;  %s143_s30 = sadd.s32 %s457_s12, %s447_s20  ;;  %s875_s29 = int_to_ptr.vmem [resolvable:$true] %s146_s29 }
  0x22   : > { %s448_s27 = sshll.u32 %s143_s30, 7  ;;  %p879_p4 = pnand %p475_p1, %p839_p3 }
  0x23   : > { %s886_s22 = scalar_lea.hbm %s1078_s0, %s448_s27  ;;  %s888_s8 = scalar_lea.sflag [#allocation3], %s132_s7 }
  0x24   : > { %s567_s12 = scalar_lea.hbm %s886_s22, 2048  ;;  %p569_p3 = pneg %p879_p4 }
  0x25   : > { %p568_p5 = scmp.ne.s32.totalorder %s886_s22, %s567_s12  ;;  %s572_s20 = scalar_lea.hbm %s1078_s0, 8192 }
  0x26   : > { %p573_p9 = scmp.lt.u32.totalorder %s886_s22, %s1078_s0  ;;  %p574_p10 = scmp.lt.u32.totalorder %s572_s20, %s567_s12 }
  0x27   : > { %p570_p6 = pnand %p569_p3, %p568_p5  ;;  %p576_p13 = scmp.lt.u32.totalorder %s567_s12, %s886_s22 }
  0x28   : > { %p575_p11 = por %p574_p10, %p573_p9 }
  0x29   : > { %p571_p8 = pneg %p570_p6 }
  0x2a   : > { %p577_p0 = por %p576_p13, %p575_p11 }
  0x2c   : > { %p578_p1 = pnand %p577_p0, %p571_p8 }
  0x2e   : > { %581 = shalt.err (!%p578_p1)
}
  0x2f   : > { %s582_s7 = scalar_lea.vmem %s875_s29, 2048  ;;  %s753_s27 = smov [#allocation2]  }
  0x30   : > { %p583_p5 = scmp.ne.s32.totalorder %s875_s29, %s582_s7  ;;  %s587_s21 = sshll.u32 %s753_s27, 4  ;;  %s588_s21 = int_to_ptr.vmem [resolvable:$false] %s587_s21 }
  0x31   : > { %s589_s26 = scalar_lea.vmem %s588_s21, 4096  ;;  %p590_p12 = scmp.lt.s32.totalorder %s875_s29, %s588_s21 }
  0x32   : > { %p585_p6 = pnand %p583_p5, %p569_p3  ;;  %p591_p9 = scmp.lt.s32.totalorder %s589_s26, %s582_s7 }
  0x34   : > { %p586_p2 = pneg %p585_p6  ;;  %p592_p10 = por %p591_p9, %p590_p12 }
  0x36   : > { %p593_p11 = pnand %p592_p10, %p586_p2 }
  0x38   : > { %596 = shalt.err (!%p593_p11)
}
  0x39   : > { %s754_s12 = smov 128   ;;  %s755_s23 = smov 8  }
  0x3a   : > { %467 = dma.hbm_to_vmem [thread:$0]  (!%p879_p4), %s886_s22, 2048, %s875_s29, %s888_s8, %s754_s12, %s754_s12, %s755_s23  }
  0x3b   : > { %p449_p3 = scmp.ge.s32.totalorder %s751_s19, 1  ;;  %p154_p8 = scmp.lt.s32.totalorder %s751_s19, 5 }
  0x3d   : > { %p155_p13 = pnand %p449_p3, %p154_p8 }
  0x3e   : > { %s160_s20 = sand.u32 (!%p155_p13), 1, %s727_s13  }
  0x3f   : > { %158 = sbr.rel (%p155_p13) target bundleno = 171 (0xab), region = 24  ;;  %s450_s25 = sshll.u32 (!%p155_p13), %s160_s20, 7 }
  0x40   : > { %s161_s30 = scalar_lea.sflag (!%p155_p13), [#allocation3], %s160_s20  ;;  %s919_s7 = scalar_lea.vmem (!%p155_p13), [#allocation2], %s450_s25 }
  0x46   : > { %698 = dma.done.wait (%p847_p7), %s161_s30, 2048  }
  0x47   : > { %700 = vsyncadd (%p847_p7), %s161_s30, 4294965248  ;;  %s926_s22 = sand.u32 1, %s715_s10   ;;  %v189_v0 = vld [vmem:[%s919_s7] sm:$0xff]  ;;  %v190_v1 = vld [vmem:[%s919_s7 + $0x8] sm:$0xff]  ;;  %vm205_vm0 = vcmask 523264   ;;  %p451_p7 = scmp.ne.s32.totalorder %s735_s15, 0 }
  0x48   : > { %v191_v2 = vld [vmem:[%s919_s7 + $0x10] sm:$0xff]  ;;  %v192_v3 = vld [vmem:[%s919_s7 + $0x18] sm:$0xff]  ;;  %v193_v4 = vld [vmem:[%s919_s7 + $0x20] sm:$0xff]  ;;  %v206_v6 = vsel %vm205_vm0, %v189_v0, -inf  ;;  %v221_v8 = vsel %vm205_vm0, %v190_v1, -inf  ;;  %v245_v41 = vsel %vm205_vm0, %v189_v0, 0.0 }
  0x49   : > { %v194_v5 = vld [vmem:[%s919_s7 + $0x28] sm:$0xff]  ;;  %v207_v7 = vsel %vm205_vm0, %v191_v2, -inf  ;;  %v195_v9 = vld [vmem:[%s919_s7 + $0x30] sm:$0xff]  ;;  %v196_v10 = vld [vmem:[%s919_s7 + $0x38] sm:$0xff]  ;;  %v208_v12 = vsel %vm205_vm0, %v193_v4, -inf  ;;  %v222_v13 = vsel %vm205_vm0, %v192_v3, -inf }
  0x4a   : > { %v197_v11 = vld [vmem:[%s919_s7 + $0x40] sm:$0xff]  ;;  %v223_v14 = vsel %vm205_vm0, %v194_v5, -inf  ;;  %v198_v15 = vld [vmem:[%s919_s7 + $0x48] sm:$0xff]  ;;  %v199_v16 = vld [vmem:[%s919_s7 + $0x50] sm:$0xff]  ;;  %v209_v18 = vmax.f32 %v206_v6, %v208_v12  ;;  %v210_v19 = vsel %vm205_vm0, %v195_v9, -inf  ;;  %v225_v27 = vsel %vm205_vm0, %v196_v10, -inf }
  0x4b   : > { %v200_v17 = vld [vmem:[%s919_s7 + $0x58] sm:$0xff]  ;;  %v212_v20 = vsel %vm205_vm0, %v197_v11, -inf  ;;  %v224_v21 = vmax.f32 %v221_v8, %v223_v14  ;;  %v201_v22 = vld [vmem:[%s919_s7 + $0x60] sm:$0xff]  ;;  %v202_v23 = vld [vmem:[%s919_s7 + $0x68] sm:$0xff]  ;;  %v211_v25 = vmax.f32 %v207_v7, %v210_v19  ;;  %v214_v26 = vsel %vm205_vm0, %v199_v16, -inf  ;;  %s181_s28 = scalar_lea.vmem [#allocation5], %s926_s22 }
  0x4c   : > { %v203_v24 = vld [vmem:[%s919_s7 + $0x70] sm:$0xff]  ;;  %v227_v28 = vsel %vm205_vm0, %v198_v15, -inf  ;;  %v204_v29 = vld [vmem:[%s919_s7 + $0x78] sm:$0xff]  ;;  %v213_v30 = vmax.f32 %v209_v18, %v212_v20  ;;  %v216_v31 = vsel %vm205_vm0, %v201_v22, -inf  ;;  %v226_v33 = vmax.f32 %v222_v13, %v225_v27  ;;  %s982_s29 = scalar_lea.vmem [#allocation6], %s926_s22 }
  0x4d   : > { %v218_v32 = vsel %vm205_vm0, %v203_v24, -inf  ;;  %v215_v34 = vmax.f32 %v211_v25, %v214_v26  ;;  %v228_v35 = vmax.f32 %v224_v21, %v227_v28  ;;  %v229_v36 = vsel %vm205_vm0, %v200_v17, -inf }
  0x4e   : > { %v231_v37 = vsel %vm205_vm0, %v202_v23, -inf  ;;  %v217_v38 = vmax.f32 %v213_v30, %v216_v31  ;;  %v230_v39 = vmax.f32 %v226_v33, %v229_v36  ;;  %v233_v40 = vsel %vm205_vm0, %v204_v29, -inf }
  0x4f   : > { %v219_v42 = vmax.f32 %v215_v34, %v218_v32  ;;  %v232_v43 = vmax.f32 %v228_v35, %v231_v37  ;;  %v246_v44 = vsel %vm205_vm0, %v191_v2, 0.0  ;;  %v248_v45 = vsel %vm205_vm0, %v193_v4, 0.0 }
  0x50   : > { %v234_v46 = vmax.f32 %v230_v39, %v233_v40  ;;  %v247_v47 = vadd.f32 %v246_v44, %v245_v41  ;;  %v250_v49 = vsel %vm205_vm0, %v195_v9, 0.0  ;;  %v260_v52 = vsel %vm205_vm0, %v190_v1, 0.0 }
  0x51   : > { %v220_v48 = vmax.f32 %v217_v38, %v219_v42  ;;  %v261_v53 = vsel %vm205_vm0, %v192_v3, 0.0  ;;  %v252_v55 = vsel %vm205_vm0, %v197_v11, 0.0  ;;  %v263_v57 = vsel %vm205_vm0, %v194_v5, 0.0 }
  0x52   : > { %v235_v50 = vmax.f32 %v232_v43, %v234_v46  ;;  %v249_v51 = vadd.f32 %v248_v45, %v247_v47  ;;  %v262_v56 = vadd.f32 %v261_v53, %v260_v52  ;;  %v265_v60 = vsel %vm205_vm0, %v196_v10, 0.0 }
  0x53   : > { %v236_v54 = vsel %vm205_vm0, %v220_v48, -inf  ;;  %v254_v62 = vsel %vm205_vm0, %v199_v16, 0.0  ;;  %v267_v1 = vsel %vm205_vm0, %v198_v15, 0.0  ;;  %v256_v3 = vsel %vm205_vm0, %v201_v22, 0.0 }
  0x54   : > { %v237_v58 = vsel %vm205_vm0, %v235_v50, -inf  ;;  %v251_v59 = vadd.f32 %v250_v49, %v249_v51  ;;  %v264_v63 = vadd.f32 %v263_v57, %v262_v56  ;;  %v269_v7 = vsel %vm205_vm0, %v200_v17, 0.0 }
  0x55   : > { %v238_v61 = vmax.f32 %v236_v54, %v237_v58  ;;  %v258_v8 = vsel %vm205_vm0, %v203_v24, 0.0  ;;  %v271_v10 = vsel %vm205_vm0, %v202_v23, 0.0  ;;  %v273_v15 = vsel %vm205_vm0, %v204_v29, 0.0 }
  0x56   : > { %v253_v0 = vadd.f32 %v252_v55, %v251_v59  ;;  %v266_v4 = vadd.f32 %v265_v60, %v264_v63  ;;  %vm288_vm1 = vcmask (!%p451_p7), 516096  }
  0x57   : > { %v239_v2 = vrot.slane %v238_v61, 4 }
  0x58   : > { %v255_v6 = vadd.f32 %v254_v62, %v253_v0  ;;  %v268_v9 = vadd.f32 %v267_v1, %v266_v4 }
  0x59   : > { %v240_v5 = vmax.f32 %v238_v61, %v239_v2 }
  0x5a   : > { %v257_v11 = vadd.f32 %v256_v3, %v255_v6  ;;  %v270_v13 = vadd.f32 %v269_v7, %v268_v9 }
  0x5b   : > { %v241_v12 = vrot.slane %v240_v5, 2 }
  0x5c   : > { %v259_v14 = vadd.f32 %v258_v8, %v257_v11  ;;  %v272_v18 = vadd.f32 %v271_v10, %v270_v13 }
  0x5d   : > { %v242_v16 = vmax.f32 %v240_v5, %v241_v12 }
  0x5e   : > { %v274_v20 = vadd.f32 %v273_v15, %v272_v18  ;;  %v275_v17 = vsel %vm205_vm0, %v259_v14, 0.0 }
  0x5f   : > { %v243_v19 = vrot.slane %v242_v16, 1 }
  0x60   : > { %v276_v22 = vsel %vm205_vm0, %v274_v20, 0.0 }
  0x61   : > { %v244_v21 = vmax.f32 %v242_v16, %v243_v19  ;;  %v277_v24 = vadd.f32 %v276_v22, %v275_v17 }
  0x63   : > { %v278_v25 = vrot.slane %v277_v24, 4  ;;  %289 = vst.msk [vmem:[%s181_s28] sm:$0x1] (!%p451_p7), %vm288_vm1, %v244_v21 }
  0x65   : > { %v279_v26 = vadd.f32 %v278_v25, %v277_v24 }
  0x67   : > { %v280_v23 = vrot.slane %v279_v26, 2  ;;  %287 = sbr.rel (%p451_p7) target bundleno = 112 (0x70), region = 32 }
  0x69   : > { %v281_v27 = vadd.f32 %v280_v23, %v279_v26 }
  0x6b   : > { %v282_v28 = vrot.slane %v281_v27, 1 }
  0x6d   : > { %v283_v30 = vadd.f32 %v282_v28, %v281_v27 }
  0x6f   : > { %290 = vst.msk [vmem:[%s982_s29] sm:$0x1] %vm288_vm1, %v283_v30 }
  0x70 PF: > { %p452_p12 = scmp.le.s32.totalorder %s735_s15, 0 }
  0x71   : > { %v295_v29 = vld [vmem:[%s181_s28] sm:$0x1] (!%p452_p12)  ;;  %vm297_vm2 = vcmask (!%p452_p12), 516096  }
  0x72   : > { %294 = sbr.rel (%p452_p12) target bundleno = 122 (0x7a), region = 36  ;;  %v296_v32 = vmax.f32 (!%p452_p12), %v295_v29, %v244_v21 }
  0x74   : > { %298 = vst.msk [vmem:[%s181_s28] sm:$0x1] (!%p452_p12), %vm297_vm2, %v296_v32 }
  0x76   : > { %v299_v31 = vld [vmem:[%s982_s29] sm:$0x1] (!%p452_p12) }
  0x77   : > { %v300_v33 = vadd.f32 (!%p452_p12), %v299_v31, %v283_v30 }
  0x79   : > { %301 = vst.msk [vmem:[%s982_s29] sm:$0x1] %vm297_vm2, %v300_v33 }
  0x7a PF: > { %s453_s24 = sshll.u32 %s739_s16, 4  ;;  %s319_s21 = sshll.u32 %s181_s28, 4  ;;  %s320_s21 = int_to_ptr.vmem [resolvable:$true] %s319_s21 }
  0x7b   : > { %s995_s15 = scalar_lea.hbm %s1079_s1, %s453_s24  ;;  %s303_s26 = scalar_lea.sflag [#allocation4], %s926_s22 }
  0x7c   : > { %s597_s12 = scalar_lea.vmem %s320_s21, 16  ;;  %p1091_p4 = scmp.ne.s32.totalorder %s1088_s3, 0 }
  0x7d   : > { %p598_p2 = scmp.ne.s32.totalorder %s320_s21, %s597_s12  ;;  %s756_s23 = smov [#allocation5]  }
  0x7e   : > { %s601_s20 = sshll.u32 %s756_s23, 4  ;;  %s602_s20 = int_to_ptr.vmem [resolvable:$false] %s601_s20 }
  0x7f   : > { %p599_p0 = pnand %p598_p2, %p1091_p4  ;;  %s603_s25 = scalar_lea.vmem %s602_s20, 32 }
  0x80   : > { %p604_p5 = scmp.lt.s32.totalorder %s320_s21, %s602_s20  ;;  %p605_p6 = scmp.lt.s32.totalorder %s603_s25, %s597_s12 }
  0x81   : > { %p600_p1 = pneg %p599_p0 }
  0x82   : > { %p606_p9 = por %p605_p6, %p604_p5 }
  0x84   : > { %p607_p10 = pnand %p606_p9, %p600_p1 }
  0x86   : > { %610 = shalt.err (!%p607_p10)
}
  0x87   : > { %s611_s30 = scalar_lea.hbm %s995_s15, 16  ;;  %s615_s8 = scalar_lea.hbm %s1079_s1, 32 }
  0x88   : > { %p612_p11 = scmp.ne.s32.totalorder %s995_s15, %s611_s30  ;;  %p616_p13 = scmp.lt.u32.totalorder %s995_s15, %s1079_s1 }
  0x89   : > { %p617_p7 = scmp.lt.u32.totalorder %s615_s8, %s611_s30  ;;  %p619_p2 = scmp.lt.u32.totalorder %s611_s30, %s995_s15 }
  0x8a   : > { %p613_p3 = pnand %p612_p11, %p1091_p4 }
  0x8b   : > { %p618_p12 = por %p617_p7, %p616_p13 }
  0x8c   : > { %p614_p8 = pneg %p613_p3 }
  0x8d   : > { %p620_p0 = por %p619_p2, %p618_p12 }
  0x8f   : > { %p621_p1 = pnand %p620_p0, %p614_p8 }
  0x91   : > { %624 = shalt.err (!%p621_p1)
}
  0x92   : > { %460 = dma.vmem_to_hbm [thread:$0]  (%p1091_p4), %s320_s21, 16, %s995_s15, %s303_s26  }
  0x93   : > { %s1020_s25 = scalar_lea.hbm %s1080_s2, %s453_s24  ;;  %s332_s7 = sshll.u32 %s982_s29, 4  ;;  %s333_s7 = int_to_ptr.vmem [resolvable:$true] %s332_s7 }
  0x94   : > { %s307_s30 = scalar_lea.sflag [#allocation7], %s926_s22  ;;  %s625_s28 = scalar_lea.vmem %s333_s7, 16 }
  0x95   : > { %p626_p5 = scmp.ne.s32.totalorder %s333_s7, %s625_s28  ;;  %s757_s8 = smov [#allocation6]  }
  0x96   : > { %s629_s27 = sshll.u32 %s757_s8, 4  ;;  %s630_s27 = int_to_ptr.vmem [resolvable:$false] %s629_s27 }
  0x97   : > { %p627_p6 = pnand %p626_p5, %p1091_p4  ;;  %s631_s23 = scalar_lea.vmem %s630_s27, 32 }
  0x98   : > { %p632_p10 = scmp.lt.s32.totalorder %s333_s7, %s630_s27  ;;  %p633_p11 = scmp.lt.s32.totalorder %s631_s23, %s625_s28 }
  0x99   : > { %p628_p9 = pneg %p627_p6 }
  0x9a   : > { %p634_p3 = por %p633_p11, %p632_p10 }
  0x9c   : > { %p635_p8 = pnand %p634_p3, %p628_p9 }
  0x9e   : > { %638 = shalt.err (!%p635_p8)
}
  0x9f   : > { %s639_s16 = scalar_lea.hbm %s1020_s25, 16  ;;  %s643_s24 = scalar_lea.hbm %s1080_s2, 32 }
  0xa0   : > { %p640_p13 = scmp.ne.s32.totalorder %s1020_s25, %s639_s16  ;;  %p644_p2 = scmp.lt.u32.totalorder %s1020_s25, %s1080_s2 }
  0xa1   : > { %p645_p0 = scmp.lt.u32.totalorder %s643_s24, %s639_s16  ;;  %p647_p5 = scmp.lt.u32.totalorder %s639_s16, %s1020_s25 }
  0xa2   : > { %p641_p7 = pnand %p640_p13, %p1091_p4 }
  0xa3   : > { %p646_p1 = por %p645_p0, %p644_p2 }
  0xa4   : > { %p642_p12 = pneg %p641_p7 }
  0xa5   : > { %p648_p6 = por %p647_p5, %p646_p1 }
  0xa7   : > { %p649_p9 = pnand %p648_p6, %p642_p12 }
  0xa9   : > { %652 = shalt.err (!%p649_p9)
}
  0xaa   : > { %461 = dma.vmem_to_hbm [thread:$0]  (%p1091_p4), %s333_s7, 16, %s1020_s25, %s307_s30  }
  0xab PF: > { %p476_p10 = scmp.ge.s32.totalorder %s751_s19, 2  ;;  %s344_s26 = sand.u32 1, %s711_s9  }
  0xac   : > { %p1092_p11 = scmp.ne.s32.totalorder %s1089_s6, 0  ;;  %s345_s12 = scalar_lea.sflag [#allocation4], %s344_s26 }
  0xae   : > { %p469_p3 = pnand %p476_p10, %p1092_p11 }
  0xb0   : > { %702 = dma.done.wait (!%p469_p3), %s345_s12, 16  }
  0xb1   : > { %704 = vsyncadd (!%p469_p3), %s345_s12, 4294967280  ;;  %s353_s20 = scalar_lea.sflag [#allocation7], %s344_s26 }
  0xb2   : > { %706 = dma.done.wait (!%p469_p3), %s353_s20, 16  }
  0xb3   : > { %708 = vsyncadd (!%p469_p3), %s353_s20, 4294967280  ;;  %s22_s19 = sadd.s32 1, %s751_s19   ;;  %s1093_s3 = sld [smem:[#allocation11_spill]] }
  0xb4   : > { %p19_p8 = scmp.ge.s32.totalorder %s22_s19, 6   ;;  %s1094_s6 = sld [smem:[#allocation12_spill]] }
  0xb5   : > { %s1095_s9 = smov %s715_s10  ;;  %s1096_s10 = smov %s719_s11 }
  0xb6   : > { %s1097_s11 = smov %s860_s4  ;;  %s1098_s12 = smov %s727_s13 }
  0xb7   : > { %s1099_s13 = smov %s731_s14  ;;  %s1100_s14 = smov %s863_s5 }
  0xb8   : > { %s1101_s15 = smov %s743_s17  ;;  %s1102_s16 = smov %s747_s18 }
  0xb9   : > { %s1103_s17 = smov %s1093_s3  ;;  %21 = sbr.rel (!%p19_p8) target bundleno = 11 (0xb), region = 94 }
  0xba   : > { %s1104_s18 = smov %s1094_s6 }
  0xc0   :  { %357 = vsyncpa [#allocation3], 1 }
  0xc1   :  { %359 = vsyncpa [#allocation3 + $0x1], 1 }
  0xc2   :  { %360 = vsyncpa [#allocation4], 1 }
  0xc3   :  { %362 = vsyncpa [#allocation4 + $0x1], 1 }
  0xc4   :  { %363 = vsyncpa [#allocation7], 1 }
  0xc5   :  { %365 = vsyncpa [#allocation7 + $0x1], 1 }

</bundles_post_ra>
